<compile_context>
chip_gen: v7x
topology: tpu7x:2x2x1
jax: 0.10.0
libtpu: 0.0.40
codegen_flags: <defaults>
</compile_context>

<pallas_src>
import jax
import jax.numpy as jnp
from jax.experimental import pallas as pl
from jax.experimental.pallas import tpu as pltpu

IN_DIM = 4
HID_DIM = 128
OUT_DIM = 2


def policy_kernel(x_ref, w1_ref, b1_ref, w2_ref, b2_ref, o_ref):
    # ---- fc1 on the VPU: x scalars live in SMEM, w1 rows are (1,128) slices ----
    w1 = w1_ref[...]                                   # (4, 128) f32 in VMEM
    h = (x_ref[0] * w1[0:1, :]
         + x_ref[1] * w1[1:2, :]
         + x_ref[2] * w1[2:3, :]
         + x_ref[3] * w1[3:4, :]
         + b1_ref[...])                                # (1, 128)
    h = jnp.maximum(h, 0.0)                            # ReLU

    # ---- fc2 on the MXU with the real-shape weight: (1,128) @ (128,2) ----
    logits = jnp.dot(h, w2_ref[...], preferred_element_type=jnp.float32)
    logits = logits + b2_ref[...]                      # (1, 2)

    # ---- numerically-stable softmax over the 2 action logits (last axis) ----
    m = jnp.max(logits, axis=-1, keepdims=True)
    e = jnp.exp(logits - m)
    denom = jnp.sum(e, axis=-1, keepdims=True)
    r = pl.reciprocal(denom, approx=True)              # EUP slot (free vs VALU)
    r = r * (2.0 - denom * r)                          # Newton step -> full f32 precision
    o_ref[...] = e * r


def prepare_params(w1, b1, w2, b2):
    """Hoisted out of the per-call path: only reshapes biases, no padding at all.

    w1: (4, 128)   (stored as in x out == PyTorch weight.T)
    b1: (128,)  -> (1, 128)
    w2: (128, 2)
    b2: (2,)    -> (1, 2)
    """
    return (w1.astype(jnp.float32),
            b1.reshape(1, HID_DIM).astype(jnp.float32),
            w2.astype(jnp.float32),
            b2.reshape(1, OUT_DIM).astype(jnp.float32))


def policy_forward(x, w1, b1_row, w2, b2_row):
    """x: (4,) f32 state; params already prepared via prepare_params -> (2,) probs."""
    out = pl.pallas_call(
        policy_kernel,
        out_shape=jax.ShapeDtypeStruct((1, OUT_DIM), jnp.float32),
        in_specs=[
            pl.BlockSpec(memory_space=pltpu.MemorySpace.SMEM),   # x: 4 scalars
            pl.BlockSpec(memory_space=pltpu.MemorySpace.VMEM),   # w1 (4,128)
            pl.BlockSpec(memory_space=pltpu.MemorySpace.VMEM),   # b1 (1,128)
            pl.BlockSpec(memory_space=pltpu.MemorySpace.VMEM),   # w2 (128,2)
            pl.BlockSpec(memory_space=pltpu.MemorySpace.VMEM),   # b2 (1,2)
        ],
        out_specs=pl.BlockSpec(memory_space=pltpu.MemorySpace.VMEM),
    )(x.astype(jnp.float32), w1, b1_row, w2, b2_row)
    return out[0]


def init_params(key):
    """Deterministic init mimicking torch.nn.Linear (U(-1/sqrt(fan_in), ...))."""
    k1, k2, k3, k4 = jax.random.split(key, 4)
    lim1 = 1.0 / jnp.sqrt(jnp.float32(IN_DIM))
    lim2 = 1.0 / jnp.sqrt(jnp.float32(HID_DIM))
    # stored as (in, out) == PyTorch weight.T
    w1 = jax.random.uniform(k1, (IN_DIM, HID_DIM), jnp.float32, -lim1, lim1)
    b1 = jax.random.uniform(k2, (HID_DIM,), jnp.float32, -lim1, lim1)
    w2 = jax.random.uniform(k3, (HID_DIM, OUT_DIM), jnp.float32, -lim2, lim2)
    b2 = jax.random.uniform(k4, (OUT_DIM,), jnp.float32, -lim2, lim2)
    return w1, b1, w2, b2


def reference_forward(x, w1, b1, w2, b2):
    h = jnp.maximum(x @ w1 + b1, 0.0)
    logits = h @ w2 + b2
    return jax.nn.softmax(logits, axis=0)   # == torch F.softmax(..., dim=0) for 1-D x


if __name__ == "__main__":
    key = jax.random.PRNGKey(0)
    pkey, xkey = jax.random.split(key)
    w1, b1, w2, b2 = init_params(pkey)
    params = prepare_params(w1, b1, w2, b2)   # reshape ONCE, reused every call
    x = jax.random.normal(xkey, (IN_DIM,), jnp.float32)   # single CartPole-style state

    fwd = jax.jit(policy_forward)
    probs = jax.block_until_ready(fwd(x, *params))

    ref = reference_forward(x, w1, b1, w2, b2)
    assert probs.shape == (OUT_DIM,)
    assert jnp.allclose(probs, ref, rtol=1e-5, atol=1e-6), (probs, ref)
    assert jnp.allclose(jnp.sum(probs), 1.0, atol=1e-5)
    # TODO(synk): the `print('a')` side effect in Policy.forward is intentionally
    # omitted so the script prints exactly KERNEL_OK.
    print("KERNEL_OK")
</pallas_src>

<mosaic_0001>
module attributes {stable_mosaic.version = 11 : i64} {
  func.func @policy_kernel(%arg0: memref<4xf32, #tpu.memory_space<smem>>, %arg1: memref<4x128xf32, #tpu.memory_space<vmem>>, %arg2: memref<1x128xf32, #tpu.memory_space<vmem>>, %arg3: memref<128x2xf32, #tpu.memory_space<vmem>>, %arg4: memref<1x2xf32, #tpu.memory_space<vmem>>, %arg5: memref<1x2xf32, #tpu.memory_space<vmem>>) attributes {dimension_semantics = [], scalar_prefetch = 0 : i64, scratch_operands = 0 : i64, tpu.core_type = #tpu.core_type<tc>} {
    %c0 = arith.constant 0 : index
    %c0_0 = arith.constant 0 : index
    %0 = vector.load %arg1[%c0, %c0_0] : memref<4x128xf32, #tpu.memory_space<vmem>>, vector<4x128xf32>
    %c0_1 = arith.constant 0 : index
    %1 = memref.load %arg0[%c0_1] : memref<4xf32, #tpu.memory_space<smem>>
    %2 = vector.extract_strided_slice %0 {offsets = [0, 0], sizes = [1, 128], strides = [1, 1]} : vector<4x128xf32> to vector<1x128xf32>
    %3 = vector.broadcast %1 : f32 to vector<1x128xf32>
    %4 = arith.mulf %3, %2 : vector<1x128xf32>
    %c1 = arith.constant 1 : index
    %5 = memref.load %arg0[%c1] : memref<4xf32, #tpu.memory_space<smem>>
    %6 = vector.extract_strided_slice %0 {offsets = [1, 0], sizes = [1, 128], strides = [1, 1]} : vector<4x128xf32> to vector<1x128xf32>
    %7 = vector.broadcast %5 : f32 to vector<1x128xf32>
    %8 = arith.mulf %7, %6 : vector<1x128xf32>
    %9 = arith.addf %4, %8 : vector<1x128xf32>
    %c2 = arith.constant 2 : index
    %10 = memref.load %arg0[%c2] : memref<4xf32, #tpu.memory_space<smem>>
    %11 = vector.extract_strided_slice %0 {offsets = [2, 0], sizes = [1, 128], strides = [1, 1]} : vector<4x128xf32> to vector<1x128xf32>
    %12 = vector.broadcast %10 : f32 to vector<1x128xf32>
    %13 = arith.mulf %12, %11 : vector<1x128xf32>
    %14 = arith.addf %9, %13 : vector<1x128xf32>
    %c3 = arith.constant 3 : index
    %15 = memref.load %arg0[%c3] : memref<4xf32, #tpu.memory_space<smem>>
    %16 = vector.extract_strided_slice %0 {offsets = [3, 0], sizes = [1, 128], strides = [1, 1]} : vector<4x128xf32> to vector<1x128xf32>
    %17 = vector.broadcast %15 : f32 to vector<1x128xf32>
    %18 = arith.mulf %17, %16 : vector<1x128xf32>
    %19 = arith.addf %14, %18 : vector<1x128xf32>
    %c0_2 = arith.constant 0 : index
    %c0_3 = arith.constant 0 : index
    %20 = vector.load %arg2[%c0_2, %c0_3] : memref<1x128xf32, #tpu.memory_space<vmem>>, vector<1x128xf32>
    %21 = arith.addf %19, %20 : vector<1x128xf32>
    %cst = arith.constant 0.000000e+00 : f32
    %22 = vector.broadcast %cst : f32 to vector<1x128xf32>
    %23 = arith.maximumf %21, %22 : vector<1x128xf32>
    %c0_4 = arith.constant 0 : index
    %c0_5 = arith.constant 0 : index
    %24 = vector.load %arg3[%c0_4, %c0_5] : memref<128x2xf32, #tpu.memory_space<vmem>>, vector<128x2xf32>
    %cst_6 = arith.constant dense<0.000000e+00> : vector<1x2xf32>
    %25 = tpu.matmul %23, %24, %cst_6 {dimension_numbers = #tpu.dot_dimension_numbers<[1], [0], [0], [1], [0, 0, 1, 1], [], []>} : vector<1x128xf32>, vector<128x2xf32>, vector<1x2xf32> -> vector<1x2xf32>
    %c0_7 = arith.constant 0 : index
    %c0_8 = arith.constant 0 : index
    %26 = vector.load %arg4[%c0_7, %c0_8] : memref<1x2xf32, #tpu.memory_space<vmem>>, vector<1x2xf32>
    %27 = arith.addf %25, %26 : vector<1x2xf32>
    %cst_9 = arith.constant dense<0xFF800000> : vector<1xf32>
    %28 = vector.multi_reduction <maximumf>, %27, %cst_9 [1] : vector<1x2xf32> to vector<1xf32>
    %29 = vector.shape_cast %28 : vector<1xf32> to vector<1x1xf32>
    %30 = vector.broadcast %29 : vector<1x1xf32> to vector<1x2xf32>
    %31 = arith.subf %27, %30 : vector<1x2xf32>
    %32 = math.exp %31 : vector<1x2xf32>
    %cst_10 = arith.constant dense<0.000000e+00> : vector<1xf32>
    %33 = vector.multi_reduction <add>, %32, %cst_10 [1] : vector<1x2xf32> to vector<1xf32>
    %34 = vector.shape_cast %33 : vector<1xf32> to vector<1x1xf32>
    %35 = tpu.reciprocal %34 {approx = true} : vector<1x1xf32> -> vector<1x1xf32>
    %36 = arith.mulf %34, %35 : vector<1x1xf32>
    %cst_11 = arith.constant 2.000000e+00 : f32
    %37 = vector.broadcast %cst_11 : f32 to vector<1x1xf32>
    %38 = arith.subf %37, %36 : vector<1x1xf32>
    %39 = arith.mulf %35, %38 : vector<1x1xf32>
    %40 = vector.broadcast %39 : vector<1x1xf32> to vector<1x2xf32>
    %41 = arith.mulf %32, %40 : vector<1x2xf32>
    %c0_12 = arith.constant 0 : index
    %c0_13 = arith.constant 0 : index
    %42 = vector.load %arg5[%c0_12, %c0_13] : memref<1x2xf32, #tpu.memory_space<vmem>>, vector<1x2xf32>
    tpu.vector_store %arg5[%c0_12, %c0_13], %41 {strides = array<i32>} : memref<1x2xf32, #tpu.memory_space<vmem>>, vector<1x2xf32>,
    return
  }
}

</mosaic_0001>

<bundles_post_ra>
// kernel: policy_forward.1
= control target key start
LH: loop header
LB: loop body
LE: loop exit
PB: predicated region body
PF: predicated region fallthrough
CT: control target
= control target key end

     0   :  { %10 = vsyncpa [#allocation4], 0  ;;  %s416_s0 = inlined_call_operand.vmem [shape: f32[4], index: 0, kind: input, shape index: {}]   ;;  %s417_s1 = inlined_call_operand.vmem [shape: f32[4,128], index: 1, kind: input, shape index: {}]   ;;  %s418_s2 = inlined_call_operand.vmem [shape: f32[1,128], index: 2, kind: input, shape index: {}]   ;;  %s419_s3 = inlined_call_operand.vmem [shape: f32[128,2], index: 3, kind: input, shape index: {}]   ;;  %s420_s4 = inlined_call_operand.vmem [shape: f32[1,2], index: 4, kind: input, shape index: {}]   ;;  %s421_s5 = inlined_call_operand.hbm [shape: f32[1,2], index: 5, kind: output, shape index: {}]  }
   0x1   :  { %11 = vsyncpa [#allocation3], 0  ;;  %s18_s20 = sshll.u32 %s416_s0, 4  ;;  %s19_s20 = int_to_ptr.vmem [resolvable:$true] %s18_s20 }
   0x2   :  { %s268_s21 = scalar_lea.vmem %s19_s20, 16  ;;  %p273_p1 = scmp.lt.s32.totalorder %s19_s20, %s19_s20 }
   0x3   :  { %p269_p0 = scmp.ne.s32.totalorder %s19_s20, %s268_s21  ;;  %p274_p2 = scmp.lt.s32.totalorder %s268_s21, %s268_s21 }
   0x5   :  { %p275_p3 = por %p274_p2, %p273_p1 }
   0x7   :  { %p276_p4 = pnand %p275_p3, %p269_p0 }
   0x9   :  { %279 = shalt.err (!%p276_p4)
}
   0xa   :  { %s306_s22 = smov [#allocation2]  }
   0xb   :  { %21 = dma.vmem_to_smem %s19_s20, 16, %s306_s22, [#allocation4]  }
   0xc   :  { %302 = dma.done.wait [#allocation4], 16  }
   0xd   :  { %303 = vsyncadd [#allocation4], 4294967280 }
   0xe   :  { %33 = sfence }
   0xf   :  { %v62_v0 = vld [vmem:[%s419_s3] sm:$0xff]  ;;  %v63_v1 = vld [vmem:[%s419_s3 + $0x8] sm:$0xff]  ;;  %v64_v2 = vld [vmem:[%s419_s3 + $0x10] sm:$0xff]  ;;  %v307_v3 = vmov 0.0|0.0   ;;  %vm308_vm0 = vmmov 0   ;;  %v309_v6 = vmov 0.0  }
  0x10   :  { %235 = vmatprep.subr.bf16.mxu0 %v307_v3  ;;  %v236_v4 = vpack.c.bf16 %v63_v1, %v62_v0  ;;  %v65_v5 = vld [vmem:[%s419_s3 + $0x18] sm:$0xff]  ;;  %232 = vmatprep.mubr.msk.f32.mxu0 %vm308_vm0, %v309_v6  ;;  %s35_s30 = sld [smem:[#allocation2]]  ;;  %s180_s6 = sld [smem:[#allocation2 + $0x1]]  ;;  %v66_v8 = vld [vmem:[%s419_s3 + $0x20] sm:$0xff]  ;;  %v67_v9 = vld [vmem:[%s419_s3 + $0x28] sm:$0xff]  ;;  %vm149_vm1 = vcmask 8192  }
  0x11   :  { %v239_v7 = vpack.c.bf16 %v65_v5, %v64_v2  ;;  %s181_s7 = sld [smem:[#allocation2 + $0x2]]  ;;  %s182_s12 = sld [smem:[#allocation2 + $0x3]]  ;;  %v34_v10 = vld [vmem:[%s417_s1] sm:$0xf]  ;;  %v242_v11 = vpack.c.bf16 %v67_v9, %v66_v8  ;;  %v68_v13 = vld [vmem:[%s419_s3 + $0x30] sm:$0xff]  ;;  %v69_v14 = vld [vmem:[%s419_s3 + $0x38] sm:$0xff] }
  0x12   :  { %237 = vmatpush3.bf16.msra.mxu0 %v236_v4  ;;  %v245_v20 = vpack.c.bf16 %v69_v14, %v68_v13  ;;  %v70_v23 = vld [vmem:[%s419_s3 + $0x40] sm:$0xff]  ;;  %v71_v24 = vld [vmem:[%s419_s3 + $0x48] sm:$0xff]  ;;  %v72_v29 = vld [vmem:[%s419_s3 + $0x50] sm:$0xff] }
  0x13   :  { %238 = vmatprep.subr.bf16.mxu0 %v307_v3  ;;  %v248_v28 = vpack.c.bf16 %v71_v24, %v70_v23  ;;  %v73_v30 = vld [vmem:[%s419_s3 + $0x58] sm:$0xff]  ;;  %v74_v34 = vld [vmem:[%s419_s3 + $0x60] sm:$0xff]  ;;  %v75_v35 = vld [vmem:[%s419_s3 + $0x68] sm:$0xff] }
  0x14   :  { %v251_v33 = vpack.c.bf16 %v73_v30, %v72_v29  ;;  %v254_v37 = vpack.c.bf16 %v75_v35, %v74_v34  ;;  %v59_v38 = vld [vmem:[%s418_s2] sm:$0x1]  ;;  %v76_v39 = vld [vmem:[%s419_s3 + $0x70] sm:$0xff]  ;;  %v77_v40 = vld [vmem:[%s419_s3 + $0x78] sm:$0xff]  ;;  %s310_s2 = smov [#allocation5]  }
  0x15   :  { %v257_v42 = vpack.c.bf16 %v77_v40, %v76_v39  ;;  %v78_v44 = vld [vmem:[%s420_s4] sm:$0x1]  ;;  %s171_s3 = sshll.u32 %s310_s2, 4  ;;  %s172_s3 = int_to_ptr.vmem [resolvable:$true] %s171_s3 }
  0x16   :  { %240 = vmatpush3.bf16.msra.mxu0 %v239_v7  ;;  %v36_v12 = vstv %s35_s30  ;;  %v39_v15 = vstv %s180_s6  ;;  %s280_s4 = scalar_lea.vmem %s172_s3, 16  ;;  %p285_p6 = scmp.lt.s32.totalorder %s172_s3, %s172_s3 }
  0x17   :  { %241 = vmatprep.subr.bf16.mxu0 %v307_v3  ;;  %v40_v16 = vmul.f32 %v39_v15, %v34_v10  ;;  %v46_v17 = vstv %s181_s7  ;;  %v37_v18 = vmul.f32 %v36_v12, %v34_v10  ;;  %v53_v22 = vstv %s182_s12  ;;  %p281_p5 = scmp.ne.s32.totalorder %s172_s3, %s280_s4  ;;  %s284_s12 = scalar_lea.vmem %s172_s3, 32 }
  0x18   :  { %v47_v19 = vmul.f32 %v46_v17, %v34_v10  ;;  %v54_v27 = vmul.f32 %v53_v22, %v34_v10  ;;  %p286_p7 = scmp.lt.s32.totalorder %s284_s12, %s280_s4 }
  0x19   :  { %v42_v21 = vrot.slane %v40_v16, 1 }
  0x1a   :  { %243 = vmatpush3.bf16.msra.mxu0 %v242_v11  ;;  %v49_v26 = vrot.slane %v47_v19, 2  ;;  %v56_v32 = vrot.slane %v54_v27, 3  ;;  %p287_p8 = por %p286_p7, %p285_p6 }
  0x1b   :  { %244 = vmatprep.subr.bf16.mxu0 %v307_v3  ;;  %v44_v25 = vadd.f32 %v42_v21, %v37_v18 }
  0x1c   :  { %p288_p9 = pnand %p287_p8, %p281_p5 }
  0x1d   :  { %v51_v31 = vadd.f32 %v49_v26, %v44_v25 }
  0x1e   :  { %246 = vmatpush3.bf16.msra.mxu0 %v245_v20 }
  0x1f   :  { %247 = vmatprep.subr.bf16.mxu0 %v307_v3  ;;  %v58_v36 = vadd.f32 %v56_v32, %v51_v31 }
  0x21   :  { %v60_v41 = vadd.f32 %v59_v38, %v58_v36 }
  0x22   :  { %249 = vmatpush3.bf16.msra.mxu0 %v248_v28 }
  0x23   :  { %250 = vmatprep.subr.bf16.mxu0 %v307_v3  ;;  %v61_v43 = vmax.f32 %v60_v41, 0.0 }
  0x26   :  { %252 = vmatpush3.bf16.msra.mxu0 %v251_v33 }
  0x27   :  { %253 = vmatprep.subr.bf16.mxu0 %v307_v3 }
  0x2a   :  { %255 = vmatpush3.bf16.msra.mxu0 %v254_v37 }
  0x2b   :  { %256 = vmatprep.subr.bf16.mxu0 %v307_v3 }
  0x2e   :  { %258 = vmatpush3.bf16.msra.mxu0 %v257_v42 }
  0x31   :  { %233 = vmatmul.mubr.f32.vlgmr.msra.gmra.mrb[0].mxu0 %v61_v43 }
 0x104   :  { %v145_v45 = vpop.f32.mrb[0].mxu0 }
 0x105   :  { %v146_v46 = vadd.f32 %v145_v45, %v78_v44  ;;  %v234_v47 = vpop.f32.mrb[1].mxu0 }
 0x107   :  { %v150_v48 = vsel %vm149_vm1, %v146_v46, -inf }
 0x108   :  { %151 = vmax.xlane.f32.xlu0 %v150_v48 }
 0x195   :  { %v152_v49 = vpop.xlane.xlu0 %151 }
 0x196   :  { %v153_v50 = vsub.f32 %v146_v46, %v152_v49 }
 0x198   :  { %v154_v51 = vmul.f32 1.442695, %v153_v50 }
 0x19a   :  { %264 = vpow2.f32 %v154_v51 }
 0x1a4   :  { %v265_v52 = vpop.eup %264 }
 0x1a5   :  { %v156_v53 = vsel %vm149_vm1, %v265_v52, 0.0 }
 0x1a6   :  { %157 = vadd.xlane.f32.xlu0 %v156_v53 }
 0x233   :  { %v158_v54 = vpop.xlane.xlu0 %157 }
 0x234   :  { %266 = vrcp.f32 %v158_v54 }
 0x23e   :  { %v267_v55 = vpop.eup %266 }
 0x23f   :  { %v160_v56 = vmul.f32 %v267_v55, %v158_v54 }
 0x241   :  { %v161_v57 = vsub.f32 2.0, %v160_v56 }
 0x243   :  { %v162_v58 = vmul.f32 %v267_v55, %v161_v57 }
 0x245   :  { %v163_v59 = vmul.f32 %v265_v52, %v162_v58 }
 0x247   :  { %164 = vst.msk [vmem:[#allocation5] sm:$0x1] %vm149_vm1, %v163_v59 }
 0x248   :  { %291 = shalt.err (!%p288_p9)
}
 0x249   :  { %s292_s15 = scalar_lea.hbm %s421_s5, 16 }
 0x24a   :  { %p293_p10 = scmp.ne.s32.totalorder %s421_s5, %s292_s15  ;;  %p296_p11 = scmp.lt.u32.totalorder %s292_s15, %s421_s5 }
 0x24c   :  { %p298_p12 = pnand %p296_p11, %p293_p10 }
 0x24e   :  { %301 = shalt.err (!%p298_p12)
}
 0x24f   :  { %174 = dma.vmem_to_hbm [thread:$0]  %s172_s3, 16, %s421_s5, [#allocation3]  }
 0x250   :  { %304 = dma.done.wait [#allocation3], 16  }
 0x251   :  { %305 = vsyncadd [#allocation3], 4294967280 }
 0x252   :  { %178 = vsyncpa [#allocation3], 1 }
 0x253   :  { %179 = vsyncpa [#allocation4], 1 }

</bundles_post_ra>
